<compile_context>
chip_gen: v6e
topology: v6e:2x2x1
jax: 0.10.0
libtpu: 0.0.40
codegen_flags: <defaults>
</compile_context>

<pallas_src>
import functools

import jax
import jax.numpy as jnp
import numpy as np
from jax import lax
from jax.experimental import pallas as pl
from jax.experimental.pallas import tpu as pltpu

# -inf stand-in for the MaxPool3d padding. It never survives the max for real
# output positions (the centre tap of every window is real data); garbage
# (sliced-away) pad columns stay finite in f32.
NEG = -1e30


def inception_kernel(xcol_ref, p_ref, wc_ref, bc_ref, sp_ref, bp_ref, o_ref, *,
                     N, Cb, H, Wp):
    """Single grid step; the whole (small) problem is resident in VMEM.

    xcol_ref : (25*Cin, N*Lout)  im2col conv RHS; contraction rows = (tap, Cin),
                                 lanes = (batch, h*Wp + w)
    p_ref    : (3*N*Cb, Lp)      NEG-padded pool planes; row j*(N*Cb)+n*Cb+c
                                 holds input channel 4*c + (j-1) of batch n,
                                 flattened padded spatial on lanes
    wc_ref   : (3*Cb, 25*Cin)    fused conv weights [1x1 | 3x3 | 5x5] with the
                                 BN scale already folded in (shared over batch)
    bc_ref   : (3*Cb, 1)         folded conv-bias + BN bias
    sp_ref   : (N*Cb, 1)         pool BN scale (rows = (n, c))
    bp_ref   : (N*Cb, 1)         pool BN bias
    o_ref    : (4*Cb, N*Lout)    lane-dense output slab (padded-grid columns)
    """
    Lout = H * Wp
    ncb = N * Cb

    # ---- conv branches: ONE MXU dot (K = 25*Cin), then bias + ReLU ----------
    y = jnp.dot(wc_ref[...], xcol_ref[...], preferred_element_type=jnp.float32)
    o_ref[0:3 * Cb, :] = jnp.maximum(y + bc_ref[...], 0.0)       # (3Cb, N*Lout)

    # ---- MaxPool3d(3, stride=(4,1,1), pad=1): separable max (2+2+2 ops) -----
    p = p_ref[...]                                               # (3*N*Cb, Lp)
    cm = jnp.maximum(jnp.maximum(p[0:ncb], p[ncb:2 * ncb]), p[2 * ncb:3 * ncb])
    Lr = Lout + 3 * Wp + 1
    r = jnp.maximum(jnp.maximum(cm[:, 0:Lr], cm[:, 1:Lr + 1]), cm[:, 2:Lr + 2])
    base = Wp + 1
    ymax = jnp.maximum(
        jnp.maximum(r[:, base:base + Lout],
                    r[:, base + Wp:base + Wp + Lout]),
        r[:, base + 2 * Wp:base + 2 * Wp + Lout])                # (N*Cb, Lout)
    yp = jnp.maximum(ymax * sp_ref[...] + bp_ref[...], 0.0)
    # Tiny (Cb x Lout) stores per batch; the bulk (conv) store above is dense.
    for n in range(N):
        o_ref[3 * Cb:4 * Cb, n * Lout:(n + 1) * Lout] = yp[n * Cb:(n + 1) * Cb]


def _round_up(x, m):
    return ((x + m - 1) // m) * m


def prepare_params(w1h, w3h, w5h, scale, bias, *, compute_dtype=jnp.float32):
    """x-independent preparation (hoist out of the per-call path).

    w1h/w3h/w5h : HWIO conv weights (1,1,Cin,Cb), (3,3,Cin,Cb), (5,5,Cin,Cb)
    scale/bias  : (4, Cb) folded BN scale / (conv-bias + BN) bias per branch
                  in the order [1x1, 3x3, 5x5, pool].
    Returns (wc, bc, sp, bp) where wc has the BN scale folded in and the taps
    flattened into the contraction dim: (3Cb, 25*Cin).
    """
    K5, K3 = 5, 3
    Cin, Cb = w1h.shape[2], w1h.shape[3]

    w1t = jnp.transpose(w1h, (0, 1, 3, 2))[0, 0]                 # (Cb, Cin)
    w3t = jnp.transpose(w3h, (0, 1, 3, 2))                       # (3,3,Cb,Cin)
    w5t = jnp.transpose(w5h, (0, 1, 3, 2))                       # (5,5,Cb,Cin)

    # per-tap fused weights on a 5x5 tap grid, output rows = [1x1 | 3x3 | 5x5]
    ws = jnp.zeros((K5 * K5, 3 * Cb, Cin), jnp.float32)
    ws = ws.at[:, 2 * Cb:3 * Cb, :].set(w5t.reshape(K5 * K5, Cb, Cin))
    off3 = (K5 - K3) // 2
    for ah in range(K3):
        for aw in range(K3):
            t = (ah + off3) * K5 + (aw + off3)
            ws = ws.at[t, Cb:2 * Cb, :].set(w3t[ah, aw])
    tc = (K5 // 2) * K5 + (K5 // 2)
    ws = ws.at[tc, 0:Cb, :].set(w1t)

    # fold the conv-branch BN scale into the weights (per output row)
    s_conv = scale[:3].reshape(3 * Cb)
    ws = ws * s_conv[None, :, None]
    wc = jnp.transpose(ws, (1, 0, 2)).reshape(3 * Cb, K5 * K5 * Cin)
    wc = wc.astype(compute_dtype)

    bc = bias[:3].reshape(3 * Cb, 1).astype(jnp.float32)
    sp = scale[3].reshape(Cb, 1).astype(jnp.float32)
    bp = bias[3].reshape(Cb, 1).astype(jnp.float32)
    return wc, bc, sp, bp


def inception_block(x_nchw, params):
    """x_nchw: (N, 4*Cb, H, W) f32; params from prepare_params(). Returns NCHW."""
    wc, bc, sp, bp = params
    N, Cin, H, W = x_nchw.shape
    Cb = Cin // 4
    K5 = 5
    P = (K5 - 1) // 2                                            # spatial pad 2
    Hp, Wp = H + 2 * P, W + 2 * P
    Lout = H * Wp
    Ktot = K5 * K5 * Cin

    # --- conv im2col RHS: rows = (tap, Cin), lanes = (batch, h*Wp + w) -------
    xz = jnp.pad(x_nchw, ((0, 0), (0, 0), (P, P), (P, P)))       # (N,Cin,Hp,Wp)
    xz = xz.reshape(N, Cin, Hp * Wp)
    xz = jnp.pad(xz, ((0, 0), (0, 0), (0, K5 - 1)))              # slice headroom
    cols = []
    for kh in range(K5):
        for kw in range(K5):
            d = kh * Wp + kw
            cols.append(xz[:, :, d:d + Lout])                    # (N, Cin, Lout)
    xcol = jnp.stack(cols, axis=0)                               # (25,N,Cin,Lout)
    xcol = jnp.transpose(xcol, (0, 2, 1, 3)).reshape(Ktot, N * Lout)
    xcol = xcol.astype(wc.dtype)

    # --- pool input: 3 channel taps (4c-1, 4c, 4c+1), NEG-padded everywhere --
    Lp = _round_up(Hp * Wp, 128)
    base_c = 4 * jnp.arange(Cb)
    planes = []
    for j in (-1, 0, 1):
        idx = base_c + j
        ok = (idx >= 0) & (idx < Cin)
        g = x_nchw[:, jnp.clip(idx, 0, Cin - 1)]                 # (N, Cb, H, W)
        g = jnp.where(ok[None, :, None, None], g, NEG)
        g = jnp.pad(g, ((0, 0), (0, 0), (P, P), (P, P)), constant_values=NEG)
        g = g.reshape(N, Cb, Hp * Wp)
        g = jnp.pad(g, ((0, 0), (0, 0), (0, Lp - Hp * Wp)),
                    constant_values=NEG)
        planes.append(g)
    pf = jnp.stack(planes, axis=0).reshape(3 * N * Cb, Lp)

    sp_all = jnp.tile(sp, (N, 1))                                # (N*Cb, 1)
    bp_all = jnp.tile(bp, (N, 1))

    kern = functools.partial(inception_kernel, N=N, Cb=Cb, H=H, Wp=Wp)
    out = pl.pallas_call(
        kern,
        out_shape=jax.ShapeDtypeStruct((4 * Cb, N * Lout), jnp.float32),
        grid=(1,),
        in_specs=[
            pl.BlockSpec((Ktot, N * Lout), lambda i: (0, 0)),
            pl.BlockSpec((3 * N * Cb, Lp), lambda i: (0, 0)),
            pl.BlockSpec((3 * Cb, Ktot), lambda i: (0, 0)),
            pl.BlockSpec((3 * Cb, 1), lambda i: (0, 0)),
            pl.BlockSpec((N * Cb, 1), lambda i: (0, 0)),
            pl.BlockSpec((N * Cb, 1), lambda i: (0, 0)),
        ],
        out_specs=pl.BlockSpec((4 * Cb, N * Lout), lambda i: (0, 0)),
        compiler_params=pltpu.CompilerParams(
            dimension_semantics=("arbitrary",)),
    )(xcol, pf, wc, bc, sp_all, bp_all)

    # padded-grid layout (4Cb, N, H, Wp) -> NCHW by dropping the pad columns
    out = out.reshape(4 * Cb, N, H, Wp)
    return jnp.transpose(out, (1, 0, 2, 3))[:, :, :, :W]


def reference(x_nchw, w1h, w3h, w5h, scale, bias):
    """Pure-JAX reference (same folded-BN semantics) for verification."""
    x = jnp.transpose(x_nchw, (0, 2, 3, 1))
    dn = ('NHWC', 'HWIO', 'NHWC')

    def conv_bn_relu(w, i):
        y = lax.conv_general_dilated(x, w, (1, 1), 'SAME',
                                     dimension_numbers=dn,
                                     precision=lax.Precision.HIGHEST)
        return jnp.maximum(y * scale[i] + bias[i], 0.0)

    y1 = conv_bn_relu(w1h, 0)
    y3 = conv_bn_relu(w3h, 1)
    y5 = conv_bn_relu(w5h, 2)
    p = lax.reduce_window(x_nchw, -jnp.inf, lax.max,
                          (1, 3, 3, 3), (1, 4, 1, 1),
                          [(0, 0), (1, 1), (1, 1), (1, 1)])
    p = jnp.transpose(p, (0, 2, 3, 1))
    yp = jnp.maximum(p * scale[3] + bias[3], 0.0)
    out = jnp.concatenate([y1, y3, y5, yp], axis=-1)
    return jnp.transpose(out, (0, 3, 1, 2))


if __name__ == "__main__":
    N, Cb, H, W = 2, 4, 16, 16
    Cin = 4 * Cb
    key = jax.random.PRNGKey(0)
    ks = jax.random.split(key, 12)

    x = jax.random.normal(ks[0], (N, Cin, H, W), jnp.float32)

    # conv weights in HWIO (kh, kw, Cin, Cb) and conv biases
    w1h = jax.random.normal(ks[1], (1, 1, Cin, Cb), jnp.float32) * 0.20
    w3h = jax.random.normal(ks[2], (3, 3, Cin, Cb), jnp.float32) * 0.10
    w5h = jax.random.normal(ks[3], (5, 5, Cin, Cb), jnp.float32) * 0.05
    cb1 = jax.random.normal(ks[4], (Cb,), jnp.float32) * 0.1
    cb3 = jax.random.normal(ks[5], (Cb,), jnp.float32) * 0.1
    cb5 = jax.random.normal(ks[6], (Cb,), jnp.float32) * 0.1

    # BatchNorm params (gamma, beta, running stats) per branch; eps = 1e-5
    gamma = jax.random.uniform(ks[7], (4, Cb), jnp.float32, 0.8, 1.2)
    beta = jax.random.normal(ks[8], (4, Cb), jnp.float32) * 0.1
    rmean = jax.random.normal(ks[9], (4, Cb), jnp.float32) * 0.1
    rvar = jax.random.uniform(ks[10], (4, Cb), jnp.float32, 0.5, 1.5)
    eps = 1e-5

    # fold conv bias + BN into per-channel scale/bias (order: 1x1, 3x3, 5x5, pool)
    scale = gamma / jnp.sqrt(rvar + eps)
    conv_biases = jnp.stack([cb1, cb3, cb5, jnp.zeros((Cb,), jnp.float32)])
    bias = beta + scale * (conv_biases - rmean)

    # x-independent prep (done once, reused across calls).
    # For v6e/v7x throughput use compute_dtype=jnp.bfloat16 (loosen tolerance).
    params = prepare_params(w1h, w3h, w5h, scale, bias,
                            compute_dtype=jnp.float32)

    out = jax.jit(inception_block)(x, params)
    jax.block_until_ready(out)

    ref = reference(x, w1h, w3h, w5h, scale, bias)
    np.testing.assert_allclose(np.asarray(out), np.asarray(ref),
                               rtol=1e-4, atol=1e-4)
    print("KERNEL_OK")
</pallas_src>

<mosaic_0001>
module attributes {stable_mosaic.version = 11 : i64} {
  func.func @inception_kernel(%arg0: i32, %arg1: memref<400x640xf32, #tpu.memory_space<vmem>>, %arg2: memref<24x512xf32, #tpu.memory_space<vmem>>, %arg3: memref<12x400xf32, #tpu.memory_space<vmem>>, %arg4: memref<12x1xf32, #tpu.memory_space<vmem>>, %arg5: memref<8x1xf32, #tpu.memory_space<vmem>>, %arg6: memref<8x1xf32, #tpu.memory_space<vmem>>, %arg7: memref<16x640xf32, #tpu.memory_space<vmem>>) attributes {dimension_semantics = [#tpu.dimension_semantics<arbitrary>], iteration_bounds = array<i64: 1>, scalar_prefetch = 0 : i64, scratch_operands = 0 : i64, tpu.core_type = #tpu.core_type<tc>, window_params = [{pipeline_mode = #tpu.pipeline_mode<synchronous>, transform_indices = @transform_0, window_bounds = array<i64: 400, 640>}, {pipeline_mode = #tpu.pipeline_mode<synchronous>, transform_indices = @transform_1, window_bounds = array<i64: 24, 512>}, {pipeline_mode = #tpu.pipeline_mode<synchronous>, transform_indices = @transform_2, window_bounds = array<i64: 12, 400>}, {pipeline_mode = #tpu.pipeline_mode<synchronous>, transform_indices = @transform_3, window_bounds = array<i64: 12, 1>}, {pipeline_mode = #tpu.pipeline_mode<synchronous>, transform_indices = @transform_4, window_bounds = array<i64: 8, 1>}, {pipeline_mode = #tpu.pipeline_mode<synchronous>, transform_indices = @transform_5, window_bounds = array<i64: 8, 1>}, {pipeline_mode = #tpu.pipeline_mode<synchronous>, transform_indices = @transform_6, window_bounds = array<i64: 16, 640>}]} {
    %c0 = arith.constant 0 : index
    %c0_0 = arith.constant 0 : index
    %0 = vector.load %arg3[%c0, %c0_0] : memref<12x400xf32, #tpu.memory_space<vmem>>, vector<12x400xf32>
    %c0_1 = arith.constant 0 : index
    %c0_2 = arith.constant 0 : index
    %1 = vector.load %arg1[%c0_1, %c0_2] : memref<400x640xf32, #tpu.memory_space<vmem>>, vector<400x640xf32>
    %cst = arith.constant dense<0.000000e+00> : vector<12x640xf32>
    %2 = tpu.matmul %0, %1, %cst {dimension_numbers = #tpu.dot_dimension_numbers<[1], [0], [0], [1], [0, 0, 1, 1], [], []>} : vector<12x400xf32>, vector<400x640xf32>, vector<12x640xf32> -> vector<12x640xf32>
    %c0_3 = arith.constant 0 : index
    %c0_4 = arith.constant 0 : index
    %3 = vector.load %arg4[%c0_3, %c0_4] : memref<12x1xf32, #tpu.memory_space<vmem>>, vector<12x1xf32>
    %4 = vector.broadcast %3 : vector<12x1xf32> to vector<12x640xf32>
    %5 = arith.addf %2, %4 : vector<12x640xf32>
    %cst_5 = arith.constant 0.000000e+00 : f32
    %6 = vector.broadcast %cst_5 : f32 to vector<12x640xf32>
    %7 = arith.maximumf %5, %6 : vector<12x640xf32>
    %c0_6 = arith.constant 0 : index
    %c0_7 = arith.constant 0 : index
    %8 = vector.load %arg7[%c0_6, %c0_7] : memref<16x640xf32, #tpu.memory_space<vmem>>, vector<12x640xf32>
    tpu.vector_store %arg7[%c0_6, %c0_7], %7 {strides = array<i32>} : memref<16x640xf32, #tpu.memory_space<vmem>>, vector<12x640xf32>,
    %c0_8 = arith.constant 0 : index
    %c0_9 = arith.constant 0 : index
    %9 = vector.load %arg2[%c0_8, %c0_9] : memref<24x512xf32, #tpu.memory_space<vmem>>, vector<24x512xf32>
    %10 = vector.extract_strided_slice %9 {offsets = [0, 0], sizes = [8, 512], strides = [1, 1]} : vector<24x512xf32> to vector<8x512xf32>
    %11 = vector.extract_strided_slice %9 {offsets = [8, 0], sizes = [8, 512], strides = [1, 1]} : vector<24x512xf32> to vector<8x512xf32>
    %12 = arith.maximumf %10, %11 : vector<8x512xf32>
    %13 = vector.extract_strided_slice %9 {offsets = [16, 0], sizes = [8, 512], strides = [1, 1]} : vector<24x512xf32> to vector<8x512xf32>
    %14 = arith.maximumf %12, %13 : vector<8x512xf32>
    %15 = vector.extract_strided_slice %14 {offsets = [0, 0], sizes = [8, 381], strides = [1, 1]} : vector<8x512xf32> to vector<8x381xf32>
    %16 = vector.extract_strided_slice %14 {offsets = [0, 1], sizes = [8, 381], strides = [1, 1]} : vector<8x512xf32> to vector<8x381xf32>
    %17 = arith.maximumf %15, %16 : vector<8x381xf32>
    %18 = vector.extract_strided_slice %14 {offsets = [0, 2], sizes = [8, 381], strides = [1, 1]} : vector<8x512xf32> to vector<8x381xf32>
    %19 = arith.maximumf %17, %18 : vector<8x381xf32>
    %20 = vector.extract_strided_slice %19 {offsets = [0, 21], sizes = [8, 320], strides = [1, 1]} : vector<8x381xf32> to vector<8x320xf32>
    %21 = vector.extract_strided_slice %19 {offsets = [0, 41], sizes = [8, 320], strides = [1, 1]} : vector<8x381xf32> to vector<8x320xf32>
    %22 = arith.maximumf %20, %21 : vector<8x320xf32>
    %23 = vector.extract_strided_slice %19 {offsets = [0, 61], sizes = [8, 320], strides = [1, 1]} : vector<8x381xf32> to vector<8x320xf32>
    %24 = arith.maximumf %22, %23 : vector<8x320xf32>
    %c0_10 = arith.constant 0 : index
    %c0_11 = arith.constant 0 : index
    %25 = vector.load %arg5[%c0_10, %c0_11] : memref<8x1xf32, #tpu.memory_space<vmem>>, vector<8x1xf32>
    %26 = vector.broadcast %25 : vector<8x1xf32> to vector<8x320xf32>
    %27 = arith.mulf %24, %26 : vector<8x320xf32>
    %c0_12 = arith.constant 0 : index
    %c0_13 = arith.constant 0 : index
    %28 = vector.load %arg6[%c0_12, %c0_13] : memref<8x1xf32, #tpu.memory_space<vmem>>, vector<8x1xf32>
    %29 = vector.broadcast %28 : vector<8x1xf32> to vector<8x320xf32>
    %30 = arith.addf %27, %29 : vector<8x320xf32>
    %cst_14 = arith.constant 0.000000e+00 : f32
    %31 = vector.broadcast %cst_14 : f32 to vector<8x320xf32>
    %32 = arith.maximumf %30, %31 : vector<8x320xf32>
    %33 = vector.extract_strided_slice %32 {offsets = [0, 0], sizes = [4, 320], strides = [1, 1]} : vector<8x320xf32> to vector<4x320xf32>
    %c12 = arith.constant 12 : index
    %c0_15 = arith.constant 0 : index
    %34 = vector.load %arg7[%c12, %c0_15] : memref<16x640xf32, #tpu.memory_space<vmem>>, vector<4x320xf32>
    tpu.vector_store %arg7[%c12, %c0_15], %33 {strides = array<i32>} : memref<16x640xf32, #tpu.memory_space<vmem>>, vector<4x320xf32>,
    %35 = vector.extract_strided_slice %32 {offsets = [4, 0], sizes = [4, 320], strides = [1, 1]} : vector<8x320xf32> to vector<4x320xf32>
    %c12_16 = arith.constant 12 : index
    %c320 = arith.constant 320 : index
    %36 = vector.load %arg7[%c12_16, %c320] : memref<16x640xf32, #tpu.memory_space<vmem>>, vector<4x320xf32>
    tpu.vector_store %arg7[%c12_16, %c320], %35 {strides = array<i32>} : memref<16x640xf32, #tpu.memory_space<vmem>>, vector<4x320xf32>,
    return
  }
  func.func @transform_0(%arg0: i32) -> (i32, i32) {
    %c0_i32 = arith.constant 0 : i32
    %c0_i32_0 = arith.constant 0 : i32
    %c0_i32_1 = arith.constant 0 : i32
    return %c0_i32, %c0_i32_0 : i32, i32
  }
  func.func @transform_1(%arg0: i32) -> (i32, i32) {
    %c0_i32 = arith.constant 0 : i32
    %c0_i32_0 = arith.constant 0 : i32
    %c0_i32_1 = arith.constant 0 : i32
    return %c0_i32, %c0_i32_0 : i32, i32
  }
  func.func @transform_2(%arg0: i32) -> (i32, i32) {
    %c0_i32 = arith.constant 0 : i32
    %c0_i32_0 = arith.constant 0 : i32
    %c0_i32_1 = arith.constant 0 : i32
    return %c0_i32, %c0_i32_0 : i32, i32
  }
  func.func @transform_3(%arg0: i32) -> (i32, i32) {
    %c0_i32 = arith.constant 0 : i32
    %c0_i32_0 = arith.constant 0 : i32
    %c0_i32_1 = arith.constant 0 : i32
    return %c0_i32, %c0_i32_0 : i32, i32
  }
  func.func @transform_4(%arg0: i32) -> (i32, i32) {
    %c0_i32 = arith.constant 0 : i32
    %c0_i32_0 = arith.constant 0 : i32
    %c0_i32_1 = arith.constant 0 : i32
    return %c0_i32, %c0_i32_0 : i32, i32
  }
  func.func @transform_5(%arg0: i32) -> (i32, i32) {
    %c0_i32 = arith.constant 0 : i32
    %c0_i32_0 = arith.constant 0 : i32
    %c0_i32_1 = arith.constant 0 : i32
    return %c0_i32, %c0_i32_0 : i32, i32
  }
  func.func @transform_6(%arg0: i32) -> (i32, i32) {
    %c0_i32 = arith.constant 0 : i32
    %c0_i32_0 = arith.constant 0 : i32
    %c0_i32_1 = arith.constant 0 : i32
    return %c0_i32, %c0_i32_0 : i32, i32
  }
}

</mosaic_0001>

<bundles_post_ra>
// kernel: inception_block.1
= control target key start
LH: loop header
LB: loop body
LE: loop exit
PB: predicated region body
PF: predicated region fallthrough
CT: control target
= control target key end

     0   :  { %v976_v3 = vmov 0   ;;  %s977_s21 = smov 127   ;;  %s978_s13 = smov 126   ;;  %vm293_vm0 = vcmask 130048   ;;  %vm802_vm1 = vcmask 1039360   ;;  %vm817_vm2 = vcmask 1031168   ;;  %s1987_s0 = inlined_call_operand.vmem [shape: f32[400,640], index: 0, kind: input, shape index: {}]   ;;  %s1988_s1 = inlined_call_operand.vmem [shape: f32[24,512], index: 1, kind: input, shape index: {}]   ;;  %s1989_s2 = inlined_call_operand.vmem [shape: f32[12,400], index: 2, kind: input, shape index: {}]   ;;  %s1990_s4 = inlined_call_operand.vmem [shape: f32[8,1], index: 4, kind: input, shape index: {}]   ;;  %s1991_s5 = inlined_call_operand.vmem [shape: f32[8,1], index: 5, kind: input, shape index: {}]   ;;  %s1992_s3 = inlined_call_operand.vmem [shape: f32[12,1], index: 3, kind: input, shape index: {}]   ;;  %s1993_s6 = inlined_call_operand.vmem [shape: f32[16,640], index: 6, kind: output, shape index: {}]  }
   0x1   :  { %v107_v0 = vld [vmem:[%s1987_s0 + $0x260] sm:$0xff]  ;;  %v106_v2 = vld [vmem:[%s1987_s0 + $0x258] sm:$0xff]  ;;  %974 = vset.pattern.permute.xlu1 %v976_v3  ;;  %975 = vset.pattern.permute.xlu0 %v976_v3  ;;  %v101_v7 = vld [vmem:[%s1987_s0 + $0x230] sm:$0xff]  ;;  %s980_s16 = smov 108   ;;  %s981_s26 = smov 88   ;;  %vm835_vm3 = vcmask 883712  }
   0x2   :  { %v267_v1 = vld [vmem:[%s1987_s0 + $0x760] sm:$0xff]  ;;  %300 = vmatprep.subr.mxu0 %v107_v0  ;;  %v266_v4 = vld [vmem:[%s1987_s0 + $0x758] sm:$0xff]  ;;  %v261_v8 = vld [vmem:[%s1987_s0 + $0x730] sm:$0xff]  ;;  %vm850_vm4 = vcmask 719872   ;;  %vm900_vm5 = vcmask 523268   ;;  %vm914_vm6 = vcmask 1048068  }
   0x3   :  { %377 = vmatprep.subr.mxu1 %v267_v1  ;;  %v102_v5 = vld [vmem:[%s1987_s0 + $0x238] sm:$0xff]  ;;  %301 = vmatpush1.msra.mxu0 %v106_v2  ;;  %v780_v9 = vld [vmem:[%s1988_s1 + $0x10] sm:$0xff]  ;;  %v778_v12 = vld [vmem:[%s1988_s1] sm:$0xff]  ;;  %vm892_vm7 = vcmask 875520   ;;  %vm908_vm8 = vcmask 351232  }
   0x4   :  { %v262_v6 = vld [vmem:[%s1987_s0 + $0x738] sm:$0xff]  ;;  %378 = vmatpush1.msra.mxu1 %v266_v4  ;;  %302 = vmatprep.subr.mxu0 %v102_v5  ;;  %v783_v10 = vld [vmem:[%s1988_s1 + $0x30] sm:$0xff]  ;;  %v781_v14 = vld [vmem:[%s1988_s1 + $0x20] sm:$0xff] }
   0x5   :  { %379 = vmatprep.subr.mxu1 %v262_v6  ;;  %v786_v11 = vld [vmem:[%s1988_s1 + $0x50] sm:$0xff]  ;;  %303 = vmatpush1.msra.mxu0 %v101_v7  ;;  %v789_v13 = vmax.f32 %v780_v9, %v783_v10  ;;  %v784_v15 = vld [vmem:[%s1988_s1 + $0x40] sm:$0xff]  ;;  %v787_v17 = vmax.f32 %v778_v12, %v781_v14  ;;  %v96_v19 = vld [vmem:[%s1987_s0 + $0x208] sm:$0xff] }
   0x6   :  { %380 = vmatpush1.msra.mxu1 %v261_v8  ;;  %v97_v16 = vld [vmem:[%s1987_s0 + $0x210] sm:$0xff]  ;;  %v256_v20 = vld [vmem:[%s1987_s0 + $0x708] sm:$0xff]  ;;  %v91_v24 = vld [vmem:[%s1987_s0 + $0x1e0] sm:$0xff] }
   0x7   :  { %304 = vmatprep.subr.mxu0 %v97_v16  ;;  %v257_v18 = vld [vmem:[%s1987_s0 + $0x710] sm:$0xff]  ;;  %v1073_v21 = vmax.f32 %v789_v13, %v786_v11  ;;  %v92_v22 = vld [vmem:[%s1987_s0 + $0x1e8] sm:$0xff]  ;;  %v1084_v25 = vmax.f32 %v787_v17, %v784_v15  ;;  %v251_v26 = vld [vmem:[%s1987_s0 + $0x6e0] sm:$0xff] }
   0x8   :  { %381 = vmatprep.subr.mxu1 %v257_v18  ;;  %305 = vmatpush1.msra.mxu0 %v96_v19  ;;  %v252_v23 = vld [vmem:[%s1987_s0 + $0x6e8] sm:$0xff]  ;;  %v87_v31 = vld [vmem:[%s1987_s0 + $0x1c0] sm:$0xff]  ;;  %v86_v33 = vld [vmem:[%s1987_s0 + $0x1b8] sm:$0xff] }
   0x9   :  { %382 = vmatpush1.msra.mxu1 %v256_v20  ;;  %306 = vmatprep.subr.mxu0 %v92_v22  ;;  %v779_v27 = vld [vmem:[%s1988_s1 + $0x8] sm:$0xff]  ;;  %v247_v32 = vld [vmem:[%s1987_s0 + $0x6c0] sm:$0xff]  ;;  %v246_v34 = vld [vmem:[%s1987_s0 + $0x6b8] sm:$0xff] }
   0xa   :  { %v782_v28 = vld [vmem:[%s1988_s1 + $0x28] sm:$0xff]  ;;  %800 = vrot.lane.b32.xlu1 %v1073_v21, %s977_s21  ;;  %383 = vmatprep.subr.mxu1 %v252_v23  ;;  %v82_v36 = vld [vmem:[%s1987_s0 + $0x198] sm:$0xff]  ;;  %v81_v38 = vld [vmem:[%s1987_s0 + $0x190] sm:$0xff] }
   0xb   :  { %v785_v29 = vld [vmem:[%s1988_s1 + $0x48] sm:$0xff]  ;;  %v788_v30 = vmax.f32 %v779_v27, %v782_v28  ;;  %796 = vrot.lane.b32.xlu0 %v1084_v25, %s977_s21  ;;  %307 = vmatpush1.msra.mxu0 %v91_v24  ;;  %v242_v37 = vld [vmem:[%s1987_s0 + $0x698] sm:$0xff]  ;;  %v241_v39 = vld [vmem:[%s1987_s0 + $0x690] sm:$0xff] }
   0xc   :  { %384 = vmatpush1.msra.mxu1 %v251_v26  ;;  %308 = vmatprep.subr.mxu0 %v87_v31  ;;  %v77_v40 = vld [vmem:[%s1987_s0 + $0x170] sm:$0xff]  ;;  %v76_v42 = vld [vmem:[%s1987_s0 + $0x168] sm:$0xff]  ;;  %v71_v46 = vld [vmem:[%s1987_s0 + $0x140] sm:$0xff] }
   0xd   :  { %v1112_v35 = vmax.f32 %v788_v30, %v785_v29  ;;  %385 = vmatprep.subr.mxu1 %v247_v32  ;;  %309 = vmatpush1.msra.mxu0 %v86_v33  ;;  %v237_v41 = vld [vmem:[%s1987_s0 + $0x670] sm:$0xff]  ;;  %v236_v43 = vld [vmem:[%s1987_s0 + $0x668] sm:$0xff]  ;;  %v231_v47 = vld [vmem:[%s1987_s0 + $0x640] sm:$0xff] }
   0xe   :  { %811 = vrot.lane.b32.xlu1 %v1084_v25, %s978_s13  ;;  %386 = vmatpush1.msra.mxu1 %v246_v34  ;;  %v72_v44 = vld [vmem:[%s1987_s0 + $0x148] sm:$0xff]  ;;  %v67_v48 = vld [vmem:[%s1987_s0 + $0x120] sm:$0xff]  ;;  %v66_v50 = vld [vmem:[%s1987_s0 + $0x118] sm:$0xff] }
   0xf   :  { %798 = vrot.lane.b32.xlu0 %v1112_v35, %s977_s21  ;;  %310 = vmatprep.subr.mxu0 %v82_v36  ;;  %v232_v45 = vld [vmem:[%s1987_s0 + $0x648] sm:$0xff]  ;;  %v227_v49 = vld [vmem:[%s1987_s0 + $0x620] sm:$0xff]  ;;  %v226_v51 = vld [vmem:[%s1987_s0 + $0x618] sm:$0xff] }
  0x10   :  { %387 = vmatprep.subr.mxu1 %v242_v37  ;;  %311 = vmatpush1.msra.mxu0 %v81_v38  ;;  %v62_v52 = vld [vmem:[%s1987_s0 + $0xf8] sm:$0xff]  ;;  %v61_v54 = vld [vmem:[%s1987_s0 + $0xf0] sm:$0xff]  ;;  %v56_v58 = vld [vmem:[%s1987_s0 + $0xc8] sm:$0xff] }
  0x11   :  { %388 = vmatpush1.msra.mxu1 %v241_v39  ;;  %312 = vmatprep.subr.mxu0 %v77_v40  ;;  %v222_v53 = vld [vmem:[%s1987_s0 + $0x5f8] sm:$0xff]  ;;  %v221_v55 = vld [vmem:[%s1987_s0 + $0x5f0] sm:$0xff]  ;;  %v216_v59 = vld [vmem:[%s1987_s0 + $0x5c8] sm:$0xff] }
  0x12   :  { %815 = vrot.lane.b32.xlu1 %v1073_v21, %s978_s13  ;;  %389 = vmatprep.subr.mxu1 %v237_v41  ;;  %v57_v56 = vld [vmem:[%s1987_s0 + $0xd0] sm:$0xff]  ;;  %v52_v60 = vld [vmem:[%s1987_s0 + $0xa8] sm:$0xff]  ;;  %v51_v62 = vld [vmem:[%s1987_s0 + $0xa0] sm:$0xff] }
  0x13   :  { %813 = vrot.lane.b32.xlu0 %v1112_v35, %s978_s13  ;;  %313 = vmatpush1.msra.mxu0 %v76_v42  ;;  %v217_v57 = vld [vmem:[%s1987_s0 + $0x5d0] sm:$0xff]  ;;  %v212_v61 = vld [vmem:[%s1987_s0 + $0x5a8] sm:$0xff]  ;;  %v211_v63 = vld [vmem:[%s1987_s0 + $0x5a0] sm:$0xff] }
  0x14   :  { %390 = vmatpush1.msra.mxu1 %v236_v43  ;;  %314 = vmatprep.subr.mxu0 %v72_v44  ;;  %v47_v0 = vld [vmem:[%s1987_s0 + $0x80] sm:$0xff]  ;;  %v46_v2 = vld [vmem:[%s1987_s0 + $0x78] sm:$0xff]  ;;  %v41_v6 = vld [vmem:[%s1987_s0 + $0x50] sm:$0xff] }
  0x15   :  { %391 = vmatprep.subr.mxu1 %v232_v45  ;;  %315 = vmatpush1.msra.mxu0 %v71_v46  ;;  %v207_v1 = vld [vmem:[%s1987_s0 + $0x580] sm:$0xff]  ;;  %v206_v3 = vld [vmem:[%s1987_s0 + $0x578] sm:$0xff]  ;;  %v201_v7 = vld [vmem:[%s1987_s0 + $0x550] sm:$0xff] }
  0x16   :  { %392 = vmatpush1.msra.mxu1 %v231_v47  ;;  %316 = vmatprep.subr.mxu0 %v67_v48  ;;  %v42_v4 = vld [vmem:[%s1987_s0 + $0x58] sm:$0xff]  ;;  %v37_v8 = vld [vmem:[%s1987_s0 + $0x30] sm:$0xff]  ;;  %v36_v10 = vld [vmem:[%s1987_s0 + $0x28] sm:$0xff] }
  0x17   :  { %393 = vmatprep.subr.mxu1 %v227_v49  ;;  %317 = vmatpush1.msra.mxu0 %v66_v50  ;;  %v202_v5 = vld [vmem:[%s1987_s0 + $0x558] sm:$0xff]  ;;  %v197_v9 = vld [vmem:[%s1987_s0 + $0x530] sm:$0xff]  ;;  %v196_v11 = vld [vmem:[%s1987_s0 + $0x528] sm:$0xff] }
  0x18   :  { %394 = vmatpush1.msra.mxu1 %v226_v51  ;;  %318 = vmatprep.subr.mxu0 %v62_v52  ;;  %v32_v12 = vld [vmem:[%s1987_s0 + $0x8] sm:$0xff]  ;;  %v31_v14 = vld [vmem:[%s1987_s0] sm:$0xff]  ;;  %v277_v17 = vld [vmem:[%s1987_s0 + $0x7b0] sm:$0xff] }
  0x19   :  { %395 = vmatprep.subr.mxu1 %v222_v53  ;;  %319 = vmatpush1.msra.mxu0 %v61_v54  ;;  %v192_v13 = vld [vmem:[%s1987_s0 + $0x508] sm:$0xff]  ;;  %v191_v15 = vld [vmem:[%s1987_s0 + $0x500] sm:$0xff]  ;;  %v186_v18 = vld [vmem:[%s1987_s0 + $0x4d8] sm:$0xff] }
  0x1a   :  { %396 = vmatpush1.msra.mxu1 %v221_v55  ;;  %320 = vmatprep.subr.mxu0 %v57_v56  ;;  %v187_v16 = vld [vmem:[%s1987_s0 + $0x4e0] sm:$0xff]  ;;  %v276_v19 = vld [vmem:[%s1987_s0 + $0x7a8] sm:$0xff]  ;;  %v182_v20 = vld [vmem:[%s1987_s0 + $0x4b8] sm:$0xff] }
  0x1b   :  { %397 = vmatprep.subr.mxu1 %v217_v57  ;;  %321 = vmatpush1.msra.mxu0 %v56_v58  ;;  %v272_v22 = vld [vmem:[%s1987_s0 + $0x788] sm:$0xff]  ;;  %v181_v23 = vld [vmem:[%s1987_s0 + $0x4b0] sm:$0xff]  ;;  %v271_v24 = vld [vmem:[%s1987_s0 + $0x780] sm:$0xff] }
  0x1c   :  { %398 = vmatpush1.msra.mxu1 %v216_v59  ;;  %322 = vmatprep.subr.mxu0 %v52_v60  ;;  %v177_v26 = vld [vmem:[%s1987_s0 + $0x490] sm:$0xff]  ;;  %v1280_v27 = vld [vmem:[%s1989_s2 + $0x18] sm:$0xff]  ;;  %v176_v29 = vld [vmem:[%s1987_s0 + $0x488] sm:$0xff] }
  0x1d   :  { %399 = vmatprep.subr.mxu1 %v212_v61  ;;  %323 = vmatpush1.msra.mxu0 %v51_v62  ;;  %v109_v28 = vld [vmem:[%s1987_s0 + $0x270] sm:$0xff]  ;;  %v108_v31 = vld [vmem:[%s1987_s0 + $0x268] sm:$0xff]  ;;  %v171_v34 = vld [vmem:[%s1987_s0 + $0x460] sm:$0xff] }
  0x1e   :  { %400 = vmatpush1.msra.mxu1 %v211_v63  ;;  %324 = vmatprep.subr.mxu0 %v47_v0  ;;  %v1291_v30 = vld [vmem:[%s1989_s2 + $0x10] sm:$0xff]  ;;  %v172_v32 = vld [vmem:[%s1987_s0 + $0x468] sm:$0xff]  ;;  %v103_v36 = vld [vmem:[%s1987_s0 + $0x240] sm:$0xff] }
  0x1f   :  { %401 = vmatprep.subr.mxu1 %v207_v1  ;;  %325 = vmatpush1.msra.mxu0 %v46_v2  ;;  %v104_v33 = vld [vmem:[%s1987_s0 + $0x248] sm:$0xff]  ;;  %v167_v37 = vld [vmem:[%s1987_s0 + $0x440] sm:$0xff]  ;;  %v166_v39 = vld [vmem:[%s1987_s0 + $0x438] sm:$0xff] }
  0x20   :  { %402 = vmatpush1.msra.mxu1 %v206_v3  ;;  %326 = vmatprep.subr.mxu0 %v42_v4  ;;  %v99_v38 = vld [vmem:[%s1987_s0 + $0x220] sm:$0xff]  ;;  %v98_v40 = vld [vmem:[%s1987_s0 + $0x218] sm:$0xff]  ;;  %v161_v43 = vld [vmem:[%s1987_s0 + $0x410] sm:$0xff] }
  0x21   :  { %403 = vmatprep.subr.mxu1 %v202_v5  ;;  %327 = vmatpush1.msra.mxu0 %v41_v6  ;;  %v162_v41 = vld [vmem:[%s1987_s0 + $0x418] sm:$0xff]  ;;  %v93_v44 = vld [vmem:[%s1987_s0 + $0x1f0] sm:$0xff]  ;;  %v156_v47 = vld [vmem:[%s1987_s0 + $0x3e8] sm:$0xff] }
  0x22   :  { %404 = vmatpush1.msra.mxu1 %v201_v7  ;;  %328 = vmatprep.subr.mxu0 %v37_v8  ;;  %v94_v42 = vld [vmem:[%s1987_s0 + $0x1f8] sm:$0xff]  ;;  %v157_v45 = vld [vmem:[%s1987_s0 + $0x3f0] sm:$0xff]  ;;  %v88_v48 = vld [vmem:[%s1987_s0 + $0x1c8] sm:$0xff] }
  0x23   :  { %405 = vmatprep.subr.mxu1 %v197_v9  ;;  %329 = vmatpush1.msra.mxu0 %v36_v10  ;;  %v89_v46 = vld [vmem:[%s1987_s0 + $0x1d0] sm:$0xff]  ;;  %v152_v49 = vld [vmem:[%s1987_s0 + $0x3c8] sm:$0xff]  ;;  %v151_v51 = vld [vmem:[%s1987_s0 + $0x3c0] sm:$0xff] }
  0x24   :  { %406 = vmatpush1.msra.mxu1 %v196_v11  ;;  %330 = vmatprep.subr.mxu0 %v32_v12  ;;  %v84_v50 = vld [vmem:[%s1987_s0 + $0x1a8] sm:$0xff]  ;;  %v83_v52 = vld [vmem:[%s1987_s0 + $0x1a0] sm:$0xff]  ;;  %v146_v55 = vld [vmem:[%s1987_s0 + $0x398] sm:$0xff] }
  0x25   :  { %407 = vmatprep.subr.mxu1 %v192_v13  ;;  %331 = vmatpush1.msra.mxu0 %v31_v14  ;;  %v147_v53 = vld [vmem:[%s1987_s0 + $0x3a0] sm:$0xff]  ;;  %v78_v56 = vld [vmem:[%s1987_s0 + $0x178] sm:$0xff]  ;;  %v141_v59 = vld [vmem:[%s1987_s0 + $0x370] sm:$0xff] }
  0x26   :  { %408 = vmatpush1.msra.mxu1 %v191_v15  ;;  %332 = vmatprep.subr.mxu0 %v187_v16  ;;  %v79_v54 = vld [vmem:[%s1987_s0 + $0x180] sm:$0xff]  ;;  %v142_v57 = vld [vmem:[%s1987_s0 + $0x378] sm:$0xff]  ;;  %v73_v60 = vld [vmem:[%s1987_s0 + $0x150] sm:$0xff] }
  0x27   :  { %437 = vmatprep.subr.mxu1 %v277_v17  ;;  %333 = vmatpush2.msra.mxu0 %v186_v18  ;;  %v74_v58 = vld [vmem:[%s1987_s0 + $0x158] sm:$0xff]  ;;  %v137_v61 = vld [vmem:[%s1987_s0 + $0x350] sm:$0xff]  ;;  %v136_v63 = vld [vmem:[%s1987_s0 + $0x348] sm:$0xff] }
  0x28   :  { %438 = vmatpush2.msra.mxu1 %v276_v19  ;;  %334 = vmatprep.subr.mxu0 %v182_v20  ;;  %v69_v62 = vld [vmem:[%s1987_s0 + $0x130] sm:$0xff]  ;;  %v68_v0 = vld [vmem:[%s1987_s0 + $0x128] sm:$0xff]  ;;  %v131_v3 = vld [vmem:[%s1987_s0 + $0x320] sm:$0xff] }
  0x29   :  { %439 = vmatprep.subr.mxu1 %v272_v22  ;;  %335 = vmatpush2.msra.mxu0 %v181_v23  ;;  %v132_v1 = vld [vmem:[%s1987_s0 + $0x328] sm:$0xff]  ;;  %v63_v4 = vld [vmem:[%s1987_s0 + $0x100] sm:$0xff]  ;;  %v126_v7 = vld [vmem:[%s1987_s0 + $0x2f8] sm:$0xff] }
  0x2a   :  { %440 = vmatpush2.msra.mxu1 %v271_v24  ;;  %336 = vmatprep.subr.mxu0 %v177_v26  ;;  %v64_v2 = vld [vmem:[%s1987_s0 + $0x108] sm:$0xff]  ;;  %v127_v5 = vld [vmem:[%s1987_s0 + $0x300] sm:$0xff]  ;;  %v58_v8 = vld [vmem:[%s1987_s0 + $0xd8] sm:$0xff] }
  0x2b   :  { %922 = vmatprep.mubr.msk.f32.mxu1 %vm293_vm0, %v1280_v27  ;;  %454 = vmatprep.subr.mxu1 %v109_v28  ;;  %v59_v6 = vld [vmem:[%s1987_s0 + $0xe0] sm:$0xff]  ;;  %v122_v9 = vld [vmem:[%s1987_s0 + $0x2d8] sm:$0xff]  ;;  %v121_v11 = vld [vmem:[%s1987_s0 + $0x2d0] sm:$0xff] }
  0x2c   :  { %337 = vmatpush2.msra.mxu0 %v176_v29  ;;  %442 = vmatmul.mubr.f32.vlgmr.msra.gmra.mxu1 %v1291_v30  ;;  %v54_v10 = vld [vmem:[%s1987_s0 + $0xb8] sm:$0xff]  ;;  %v53_v12 = vld [vmem:[%s1987_s0 + $0xb0] sm:$0xff]  ;;  %v116_v15 = vld [vmem:[%s1987_s0 + $0x2a8] sm:$0xff] }
  0x2d   :  { %455 = vmatpush1.msra.mxu1 %v108_v31  ;;  %338 = vmatprep.subr.mxu0 %v172_v32  ;;  %v117_v13 = vld [vmem:[%s1987_s0 + $0x2b0] sm:$0xff]  ;;  %v48_v16 = vld [vmem:[%s1987_s0 + $0x88] sm:$0xff]  ;;  %v111_v19 = vld [vmem:[%s1987_s0 + $0x280] sm:$0xff] }
  0x2e   :  { %456 = vmatprep.subr.mxu1 %v104_v33  ;;  %339 = vmatpush2.msra.mxu0 %v171_v34  ;;  %v49_v14 = vld [vmem:[%s1987_s0 + $0x90] sm:$0xff]  ;;  %v112_v17 = vld [vmem:[%s1987_s0 + $0x288] sm:$0xff]  ;;  %v43_v20 = vld [vmem:[%s1987_s0 + $0x60] sm:$0xff] }
  0x2f   :  { %457 = vmatpush1.msra.mxu1 %v103_v36  ;;  %340 = vmatprep.subr.mxu0 %v167_v37  ;;  %v44_v18 = vld [vmem:[%s1987_s0 + $0x68] sm:$0xff]  ;;  %v39_v23 = vld [vmem:[%s1987_s0 + $0x40] sm:$0xff]  ;;  %v269_v24 = vld [vmem:[%s1987_s0 + $0x770] sm:$0xff] }
  0x30   :  { %458 = vmatprep.subr.mxu1 %v99_v38  ;;  %341 = vmatpush2.msra.mxu0 %v166_v39  ;;  %v1458_v22 = vld [vmem:[%s1989_s2 + $0x8] sm:$0xff]  ;;  %v1469_v26 = vld [vmem:[%s1989_s2] sm:$0xff]  ;;  %v38_v28 = vld [vmem:[%s1987_s0 + $0x38] sm:$0xff] }
  0x31   :  { %459 = vmatpush1.msra.mxu1 %v98_v40  ;;  %342 = vmatprep.subr.mxu0 %v162_v41  ;;  %v268_v29 = vld [vmem:[%s1987_s0 + $0x768] sm:$0xff]  ;;  %v34_v31 = vld [vmem:[%s1987_s0 + $0x18] sm:$0xff]  ;;  %v33_v33 = vld [vmem:[%s1987_s0 + $0x10] sm:$0xff] }
  0x32   :  { %460 = vmatprep.subr.mxu1 %v94_v42  ;;  %343 = vmatpush2.msra.mxu0 %v161_v43  ;;  %v264_v32 = vld [vmem:[%s1987_s0 + $0x748] sm:$0xff]  ;;  %v263_v34 = vld [vmem:[%s1987_s0 + $0x740] sm:$0xff]  ;;  %v189_v36 = vld [vmem:[%s1987_s0 + $0x4f0] sm:$0xff] }
  0x33   :  { %461 = vmatpush1.msra.mxu1 %v93_v44  ;;  %344 = vmatprep.subr.mxu0 %v157_v45  ;;  %v259_v37 = vld [vmem:[%s1987_s0 + $0x720] sm:$0xff]  ;;  %v188_v38 = vld [vmem:[%s1987_s0 + $0x4e8] sm:$0xff]  ;;  %v258_v39 = vld [vmem:[%s1987_s0 + $0x718] sm:$0xff] }
  0x34   :  { %462 = vmatprep.subr.mxu1 %v89_v46  ;;  %345 = vmatpush2.msra.mxu0 %v156_v47  ;;  %v1506_v40 = vld [vmem:[%s1989_s2 + $0x28] sm:$0xf]  ;;  %v254_v42 = vld [vmem:[%s1987_s0 + $0x6f8] sm:$0xff]  ;;  %v1517_v43 = vld [vmem:[%s1989_s2 + $0x20] sm:$0xf] }
  0x35   :  { %463 = vmatpush1.msra.mxu1 %v88_v48  ;;  %346 = vmatprep.subr.mxu0 %v152_v49  ;;  %v184_v41 = vld [vmem:[%s1987_s0 + $0x4c8] sm:$0xff]  ;;  %v183_v44 = vld [vmem:[%s1987_s0 + $0x4c0] sm:$0xff]  ;;  %v253_v45 = vld [vmem:[%s1987_s0 + $0x6f0] sm:$0xff] }
  0x36   :  { %464 = vmatprep.subr.mxu1 %v84_v50  ;;  %347 = vmatpush2.msra.mxu0 %v151_v51  ;;  %v1529_v46 = vld [vmem:[%s1989_s2 + $0x38] sm:$0xf]  ;;  %v179_v47 = vld [vmem:[%s1987_s0 + $0x4a0] sm:$0xff]  ;;  %v249_v48 = vld [vmem:[%s1987_s0 + $0x6d0] sm:$0xff] }
  0x37   :  { %465 = vmatpush1.msra.mxu1 %v83_v52  ;;  %348 = vmatprep.subr.mxu0 %v147_v53  ;;  %v1541_v49 = vld [vmem:[%s1989_s2 + $0x30] sm:$0xf]  ;;  %v248_v50 = vld [vmem:[%s1987_s0 + $0x6c8] sm:$0xff]  ;;  %v178_v51 = vld [vmem:[%s1987_s0 + $0x498] sm:$0xff]  ;;  %s983_s2 = smov 107  }
  0x38   :  { %466 = vmatprep.subr.mxu1 %v79_v54  ;;  %349 = vmatpush2.msra.mxu0 %v146_v55  ;;  %v244_v52 = vld [vmem:[%s1987_s0 + $0x6a8] sm:$0xff]  ;;  %v174_v53 = vld [vmem:[%s1987_s0 + $0x478] sm:$0xff]  ;;  %v243_v54 = vld [vmem:[%s1987_s0 + $0x6a0] sm:$0xff] }
  0x39   :  { %467 = vmatpush1.msra.mxu1 %v78_v56  ;;  %350 = vmatprep.subr.mxu0 %v142_v57  ;;  %v173_v55 = vld [vmem:[%s1987_s0 + $0x470] sm:$0xff]  ;;  %v239_v56 = vld [vmem:[%s1987_s0 + $0x680] sm:$0xff] }
  0x3a   :  { %468 = vmatprep.subr.mxu1 %v74_v58  ;;  %351 = vmatpush2.msra.mxu0 %v141_v59  ;;  %v169_v57 = vld [vmem:[%s1987_s0 + $0x450] sm:$0xff]  ;;  %v238_v58 = vld [vmem:[%s1987_s0 + $0x678] sm:$0xff]  ;;  %v168_v59 = vld [vmem:[%s1987_s0 + $0x448] sm:$0xff] }
  0x3b   :  { %469 = vmatpush1.msra.mxu1 %v73_v60  ;;  %352 = vmatprep.subr.mxu0 %v137_v61  ;;  %v234_v60 = vld [vmem:[%s1987_s0 + $0x658] sm:$0xff]  ;;  %v164_v61 = vld [vmem:[%s1987_s0 + $0x428] sm:$0xff] }
  0x3c   :  { %470 = vmatprep.subr.mxu1 %v69_v62  ;;  %353 = vmatpush2.msra.mxu0 %v136_v63  ;;  %v233_v62 = vld [vmem:[%s1987_s0 + $0x650] sm:$0xff]  ;;  %v163_v63 = vld [vmem:[%s1987_s0 + $0x420] sm:$0xff] }
  0x3d   :  { %471 = vmatpush1.msra.mxu1 %v68_v0  ;;  %354 = vmatprep.subr.mxu0 %v132_v1  ;;  %v229_v0 = vld [vmem:[%s1987_s0 + $0x630] sm:$0xff]  ;;  %v159_v1 = vld [vmem:[%s1987_s0 + $0x400] sm:$0xff] }
  0x3e   :  { %472 = vmatprep.subr.mxu1 %v64_v2  ;;  %355 = vmatpush2.msra.mxu0 %v131_v3  ;;  %v228_v2 = vld [vmem:[%s1987_s0 + $0x628] sm:$0xff]  ;;  %v158_v3 = vld [vmem:[%s1987_s0 + $0x3f8] sm:$0xff] }
  0x3f   :  { %473 = vmatpush1.msra.mxu1 %v63_v4  ;;  %356 = vmatprep.subr.mxu0 %v127_v5  ;;  %v224_v4 = vld [vmem:[%s1987_s0 + $0x608] sm:$0xff]  ;;  %v154_v5 = vld [vmem:[%s1987_s0 + $0x3d8] sm:$0xff] }
  0x40   :  { %474 = vmatprep.subr.mxu1 %v59_v6  ;;  %357 = vmatpush2.msra.mxu0 %v126_v7  ;;  %v223_v6 = vld [vmem:[%s1987_s0 + $0x600] sm:$0xff]  ;;  %v153_v7 = vld [vmem:[%s1987_s0 + $0x3d0] sm:$0xff] }
  0x41   :  { %475 = vmatpush1.msra.mxu1 %v58_v8  ;;  %358 = vmatprep.subr.mxu0 %v122_v9  ;;  %v219_v8 = vld [vmem:[%s1987_s0 + $0x5e0] sm:$0xff]  ;;  %v149_v9 = vld [vmem:[%s1987_s0 + $0x3b0] sm:$0xff] }
  0x42   :  { %476 = vmatprep.subr.mxu1 %v54_v10  ;;  %359 = vmatpush2.msra.mxu0 %v121_v11  ;;  %v218_v10 = vld [vmem:[%s1987_s0 + $0x5d8] sm:$0xff]  ;;  %v148_v11 = vld [vmem:[%s1987_s0 + $0x3a8] sm:$0xff] }
  0x43   :  { %477 = vmatpush1.msra.mxu1 %v53_v12  ;;  %360 = vmatprep.subr.mxu0 %v117_v13  ;;  %v214_v12 = vld [vmem:[%s1987_s0 + $0x5b8] sm:$0xff]  ;;  %v144_v13 = vld [vmem:[%s1987_s0 + $0x388] sm:$0xff] }
  0x44   :  { %478 = vmatprep.subr.mxu1 %v49_v14  ;;  %361 = vmatpush2.msra.mxu0 %v116_v15  ;;  %v213_v14 = vld [vmem:[%s1987_s0 + $0x5b0] sm:$0xff]  ;;  %v143_v15 = vld [vmem:[%s1987_s0 + $0x380] sm:$0xff] }
  0x45   :  { %479 = vmatpush1.msra.mxu1 %v48_v16  ;;  %362 = vmatprep.subr.mxu0 %v112_v17  ;;  %v209_v16 = vld [vmem:[%s1987_s0 + $0x590] sm:$0xff]  ;;  %v139_v17 = vld [vmem:[%s1987_s0 + $0x360] sm:$0xff] }
  0x46   :  { %480 = vmatprep.subr.mxu1 %v44_v18  ;;  %363 = vmatpush2.msra.mxu0 %v111_v19  ;;  %v208_v18 = vld [vmem:[%s1987_s0 + $0x588] sm:$0xff]  ;;  %v138_v19 = vld [vmem:[%s1987_s0 + $0x358] sm:$0xff] }
  0x47   :  { %481 = vmatpush1.msra.mxu1 %v43_v20  ;;  %364 = vmatprep.mubr.f32.mxu0 %v1458_v22  ;;  %v204_v20 = vld [vmem:[%s1987_s0 + $0x568] sm:$0xff] }
  0x48   :  { %482 = vmatprep.subr.mxu1 %v39_v23  ;;  %531 = vmatprep.subr.mxu0 %v269_v24  ;;  %v134_v23 = vld [vmem:[%s1987_s0 + $0x338] sm:$0xff]  ;;  %v203_v24 = vld [vmem:[%s1987_s0 + $0x560] sm:$0xff] }
  0x49   :  { %365 = vmatmul.mubr.f32.vlgmr.msra.gmra.mxu0 %v1469_v26  ;;  %483 = vmatpush1.msra.mxu1 %v38_v28  ;;  %v133_v28 = vld [vmem:[%s1987_s0 + $0x330] sm:$0xff] }
  0x4a   :  { %532 = vmatpush1.msra.mxu0 %v268_v29  ;;  %484 = vmatprep.subr.mxu1 %v34_v31  ;;  %v199_v29 = vld [vmem:[%s1987_s0 + $0x540] sm:$0xff]  ;;  %v129_v31 = vld [vmem:[%s1987_s0 + $0x310] sm:$0xff] }
  0x4b   :  { %533 = vmatprep.subr.mxu0 %v264_v32  ;;  %485 = vmatpush1.msra.mxu1 %v33_v33  ;;  %v198_v32 = vld [vmem:[%s1987_s0 + $0x538] sm:$0xff]  ;;  %v128_v33 = vld [vmem:[%s1987_s0 + $0x308] sm:$0xff] }
  0x4c   :  { %534 = vmatpush1.msra.mxu0 %v263_v34  ;;  %486 = vmatprep.subr.mxu1 %v189_v36  ;;  %v194_v34 = vld [vmem:[%s1987_s0 + $0x518] sm:$0xff]  ;;  %v124_v36 = vld [vmem:[%s1987_s0 + $0x2e8] sm:$0xff] }
  0x4d   :  { %535 = vmatprep.subr.mxu0 %v259_v37  ;;  %487 = vmatpush2.msra.mxu1 %v188_v38  ;;  %v193_v37 = vld [vmem:[%s1987_s0 + $0x510] sm:$0xff]  ;;  %v123_v38 = vld [vmem:[%s1987_s0 + $0x2e0] sm:$0xff] }
  0x4e   :  { %536 = vmatpush1.msra.mxu0 %v258_v39  ;;  %370 = vmatprep.mubr.f32.mxu0 %v1506_v40  ;;  %v279_v39 = vld [vmem:[%s1987_s0 + $0x7c0] sm:$0xff] }
  0x4f   :  { %488 = vmatprep.subr.mxu1 %v184_v41  ;;  %537 = vmatprep.subr.mxu0 %v254_v42  ;;  %v119_v41 = vld [vmem:[%s1987_s0 + $0x2c0] sm:$0xff]  ;;  %v278_v42 = vld [vmem:[%s1987_s0 + $0x7b8] sm:$0xff] }
  0x50   :  { %371 = vmatmul.mubr.f32.gmra.mxu0 %v1517_v43  ;;  %489 = vmatpush2.msra.mxu1 %v183_v44  ;;  %v118_v44 = vld [vmem:[%s1987_s0 + $0x2b8] sm:$0xff] }
  0x51   :  { %538 = vmatpush1.msra.mxu0 %v253_v45  ;;  %923 = vmatprep.mubr.msk.f32.mxu1 %vm293_vm0, %v1529_v46  ;;  %v274_v45 = vld [vmem:[%s1987_s0 + $0x798] sm:$0xff] }
  0x52   :  { %490 = vmatprep.subr.mxu1 %v179_v47  ;;  %539 = vmatprep.subr.mxu0 %v249_v48  ;;  %v114_v47 = vld [vmem:[%s1987_s0 + $0x298] sm:$0xff]  ;;  %v113_v48 = vld [vmem:[%s1987_s0 + $0x290] sm:$0xff] }
  0x53   :  { %448 = vmatmul.mubr.f32.gmra.mxu1 %v1541_v49  ;;  %540 = vmatpush1.msra.mxu0 %v248_v50  ;;  %v273_v50 = vld [vmem:[%s1987_s0 + $0x790] sm:$0xff] }
  0x54   :  { %491 = vmatpush2.msra.mxu1 %v178_v51  ;;  %541 = vmatprep.subr.mxu0 %v244_v52  ;;  %v190_v51 = vld [vmem:[%s1987_s0 + $0x4f8] sm:$0xff] }
  0x55   :  { %492 = vmatprep.subr.mxu1 %v174_v53  ;;  %542 = vmatpush1.msra.mxu0 %v243_v54  ;;  %v110_v52 = vld [vmem:[%s1987_s0 + $0x278] sm:$0xff]  ;;  %v185_v53 = vld [vmem:[%s1987_s0 + $0x4d0] sm:$0xff] }
  0x56   :  { %493 = vmatpush2.msra.mxu1 %v173_v55  ;;  %543 = vmatprep.subr.mxu0 %v239_v56  ;;  %v105_v54 = vld [vmem:[%s1987_s0 + $0x250] sm:$0xff]  ;;  %v270_v55 = vld [vmem:[%s1987_s0 + $0x778] sm:$0xff]  ;;  %v979_v56 = vmov 0.0  }
  0x57   :  { %494 = vmatprep.subr.mxu1 %v169_v57  ;;  %544 = vmatpush1.msra.mxu0 %v238_v58  ;;  %v180_v57 = vld [vmem:[%s1987_s0 + $0x4a8] sm:$0xff] }
  0x58   :  { %495 = vmatpush2.msra.mxu1 %v168_v59  ;;  %545 = vmatprep.subr.mxu0 %v234_v60  ;;  %v100_v58 = vld [vmem:[%s1987_s0 + $0x228] sm:$0xff]  ;;  %v265_v59 = vld [vmem:[%s1987_s0 + $0x750] sm:$0xff]  ;;  %v175_v60 = vld [vmem:[%s1987_s0 + $0x480] sm:$0xff] }
  0x59   :  { %496 = vmatprep.subr.mxu1 %v164_v61  ;;  %546 = vmatpush1.msra.mxu0 %v233_v62  ;;  %v95_v61 = vld [vmem:[%s1987_s0 + $0x200] sm:$0xff]  ;;  %v260_v62 = vld [vmem:[%s1987_s0 + $0x728] sm:$0xff] }
  0x5a   :  { %497 = vmatpush2.msra.mxu1 %v163_v63  ;;  %547 = vmatprep.subr.mxu0 %v229_v0  ;;  %v170_v63 = vld [vmem:[%s1987_s0 + $0x458] sm:$0xff] }
  0x5b   :  { %498 = vmatprep.subr.mxu1 %v159_v1  ;;  %548 = vmatpush1.msra.mxu0 %v228_v2  ;;  %v90_v0 = vld [vmem:[%s1987_s0 + $0x1d8] sm:$0xff]  ;;  %v255_v1 = vld [vmem:[%s1987_s0 + $0x700] sm:$0xff]  ;;  %v165_v2 = vld [vmem:[%s1987_s0 + $0x430] sm:$0xff] }
  0x5c   :  { %499 = vmatpush2.msra.mxu1 %v158_v3  ;;  %549 = vmatprep.subr.mxu0 %v224_v4  ;;  %v85_v3 = vld [vmem:[%s1987_s0 + $0x1b0] sm:$0xff]  ;;  %v250_v4 = vld [vmem:[%s1987_s0 + $0x6d8] sm:$0xff] }
  0x5d   :  { %500 = vmatprep.subr.mxu1 %v154_v5  ;;  %550 = vmatpush1.msra.mxu0 %v223_v6  ;;  %v160_v5 = vld [vmem:[%s1987_s0 + $0x408] sm:$0xff] }
  0x5e   :  { %501 = vmatpush2.msra.mxu1 %v153_v7  ;;  %551 = vmatprep.subr.mxu0 %v219_v8  ;;  %v80_v6 = vld [vmem:[%s1987_s0 + $0x188] sm:$0xff]  ;;  %v245_v7 = vld [vmem:[%s1987_s0 + $0x6b0] sm:$0xff]  ;;  %v155_v8 = vld [vmem:[%s1987_s0 + $0x3e0] sm:$0xff] }
  0x5f   :  { %502 = vmatprep.subr.mxu1 %v149_v9  ;;  %552 = vmatpush1.msra.mxu0 %v218_v10  ;;  %v75_v10 = vld [vmem:[%s1987_s0 + $0x160] sm:$0xff] }
  0x60   :  { %503 = vmatpush2.msra.mxu1 %v148_v11  ;;  %553 = vmatprep.subr.mxu0 %v214_v12  ;;  %v240_v12 = vld [vmem:[%s1987_s0 + $0x688] sm:$0xff] }
  0x61   :  { %504 = vmatprep.subr.mxu1 %v144_v13  ;;  %554 = vmatpush1.msra.mxu0 %v213_v14  ;;  %v150_v13 = vld [vmem:[%s1987_s0 + $0x3b8] sm:$0xff]  ;;  %v859_v14 = vld [vmem:[%s1990_s4] sm:$0xff] }
  0x62   :  { %505 = vmatpush2.msra.mxu1 %v143_v15  ;;  %555 = vmatprep.subr.mxu0 %v209_v16  ;;  %v70_v15 = vld [vmem:[%s1987_s0 + $0x138] sm:$0xff]  ;;  %v235_v16 = vld [vmem:[%s1987_s0 + $0x660] sm:$0xff] }
  0x63   :  { %506 = vmatprep.subr.mxu1 %v139_v17  ;;  %556 = vmatpush1.msra.mxu0 %v208_v18  ;;  %v145_v18 = vld [vmem:[%s1987_s0 + $0x390] sm:$0xff] }
  0x64   :  { %507 = vmatpush2.msra.mxu1 %v138_v19  ;;  %557 = vmatprep.subr.mxu0 %v204_v20  ;;  %v65_v20 = vld [vmem:[%s1987_s0 + $0x110] sm:$0xff] }
  0x65   :  { %508 = vmatprep.subr.mxu1 %v134_v23  ;;  %558 = vmatpush1.msra.mxu0 %v203_v24  ;;  %v230_v23 = vld [vmem:[%s1987_s0 + $0x638] sm:$0xff]  ;;  %v140_v24 = vld [vmem:[%s1987_s0 + $0x368] sm:$0xff] }
  0x66   :  { %509 = vmatpush2.msra.mxu1 %v133_v28  ;;  %559 = vmatprep.subr.mxu0 %v199_v29  ;;  %v60_v28 = vld [vmem:[%s1987_s0 + $0xe8] sm:$0xff]  ;;  %v225_v29 = vld [vmem:[%s1987_s0 + $0x610] sm:$0xff] }
  0x67   :  { %510 = vmatprep.subr.mxu1 %v129_v31  ;;  %560 = vmatpush1.msra.mxu0 %v198_v32  ;;  %v135_v31 = vld [vmem:[%s1987_s0 + $0x340] sm:$0xff] }
  0x68   :  { %511 = vmatpush2.msra.mxu1 %v128_v33  ;;  %561 = vmatprep.subr.mxu0 %v194_v34  ;;  %v55_v32 = vld [vmem:[%s1987_s0 + $0xc0] sm:$0xff]  ;;  %v220_v33 = vld [vmem:[%s1987_s0 + $0x5e8] sm:$0xff] }
  0x69   :  { %512 = vmatprep.subr.mxu1 %v124_v36  ;;  %562 = vmatpush1.msra.mxu0 %v193_v37 }
  0x6a   :  { %513 = vmatpush2.msra.mxu1 %v123_v38  ;;  %591 = vmatprep.subr.mxu0 %v279_v39  ;;  %v130_v38 = vld [vmem:[%s1987_s0 + $0x318] sm:$0xff] }
  0x6b   :  { %514 = vmatprep.subr.mxu1 %v119_v41  ;;  %592 = vmatpush2.msra.mxu0 %v278_v42  ;;  %v50_v39 = vld [vmem:[%s1987_s0 + $0x98] sm:$0xff]  ;;  %v215_v41 = vld [vmem:[%s1987_s0 + $0x5c0] sm:$0xff] }
  0x6c   :  { %515 = vmatpush2.msra.mxu1 %v118_v44  ;;  %593 = vmatprep.subr.mxu0 %v274_v45  ;;  %v125_v45 = vld [vmem:[%s1987_s0 + $0x2f0] sm:$0xff] }
  0x6d   :  { %516 = vmatprep.subr.mxu1 %v114_v47  ;;  %518 = vmatprep.mubr.f32.mxu1 %v1458_v22 }
  0x6e   :  { %517 = vmatpush2.msra.mxu1 %v113_v48  ;;  %594 = vmatpush2.msra.mxu0 %v273_v50  ;;  %v45_v48 = vld [vmem:[%s1987_s0 + $0x70] sm:$0xff] }
  0x6f   :  { %519 = vmatmul.mubr.f32.vlgmr.msra.gmra.mxu1 %v1469_v26  ;;  %924 = vmatprep.mubr.msk.f32.mxu0 %vm293_vm0, %v1280_v27 }
  0x70   :  { %928 = vmatprep.subr.mxu0 %v190_v51  ;;  %596 = vmatmul.mubr.f32.vlgmr.msra.gmra.mxu0 %v1291_v30  ;;  %v120_v51 = vld [vmem:[%s1987_s0 + $0x2c8] sm:$0xff] }
  0x71   :  { %929 = vmatpush3.msra.mxu0 %v110_v52  ;;  %683 = vmatprep.subr.mxu1 %v979_v56  ;;  %v40_v52 = vld [vmem:[%s1987_s0 + $0x48] sm:$0xff] }
  0x72   :  { %930 = vmatprep.subr.mxu0 %v185_v53  ;;  %524 = vmatprep.mubr.f32.mxu1 %v1506_v40 }
  0x73   :  { %931 = vmatpush3.msra.mxu0 %v105_v54  ;;  %684 = vmatpush1.msra.mxu1 %v270_v55  ;;  %v205_v54 = vld [vmem:[%s1987_s0 + $0x570] sm:$0xff]  ;;  %v115_v55 = vld [vmem:[%s1987_s0 + $0x2a0] sm:$0xff] }
  0x74   :  { %525 = vmatmul.mubr.f32.gmra.mxu1 %v1517_v43  ;;  %932 = vmatprep.subr.mxu0 %v180_v57 }
  0x75   :  { %685 = vmatprep.subr.mxu1 %v979_v56  ;;  %925 = vmatprep.mubr.msk.f32.mxu0 %vm293_vm0, %v1529_v46 }
  0x76   :  { %933 = vmatpush3.msra.mxu0 %v100_v58  ;;  %686 = vmatpush1.msra.mxu1 %v265_v59  ;;  %v35_v58 = vld [vmem:[%s1987_s0 + $0x20] sm:$0xff] }
  0x77   :  { %602 = vmatmul.mubr.f32.gmra.mxu0 %v1541_v49  ;;  %934 = vmatprep.subr.mxu0 %v175_v60  ;;  %v200_v60 = vld [vmem:[%s1987_s0 + $0x548] sm:$0xff] }
  0x78   :  { %687 = vmatprep.subr.mxu1 %v979_v56  ;;  %935 = vmatpush3.msra.mxu0 %v95_v61 }
  0x79   :  { %688 = vmatpush1.msra.mxu1 %v260_v62  ;;  %936 = vmatprep.subr.mxu0 %v170_v63  ;;  %v195_v62 = vld [vmem:[%s1987_s0 + $0x520] sm:$0xff] }
  0x7a   :  { %689 = vmatprep.subr.mxu1 %v979_v56  ;;  %937 = vmatpush3.msra.mxu0 %v90_v0 }
  0x7b   :  { %690 = vmatpush1.msra.mxu1 %v255_v1  ;;  %938 = vmatprep.subr.mxu0 %v165_v2 }
  0x7c   :  { %691 = vmatprep.subr.mxu1 %v979_v56  ;;  %939 = vmatpush3.msra.mxu0 %v85_v3  ;;  %v1786_v9 = vpop.permute.xlu1 %800 }
  0x7d   :  { %692 = vmatpush1.msra.mxu1 %v250_v4  ;;  %940 = vmatprep.subr.mxu0 %v160_v5  ;;  %v1791_v11 = vpop.permute.xlu0 %796  ;;  %v810_v42 = vmax.f32 %v1073_v21, %v1786_v9  ;;  %v210_v21 = vld [vmem:[%s1987_s0 + $0x598] sm:$0xff] }
  0x7e   :  { %693 = vmatprep.subr.mxu1 %v979_v56  ;;  %941 = vmatpush3.msra.mxu0 %v80_v6 }
  0x7f   :  { %694 = vmatpush1.msra.mxu1 %v245_v7  ;;  %942 = vmatprep.subr.mxu0 %v155_v8 }
  0x80   :  { %695 = vmatprep.subr.mxu1 %v979_v56  ;;  %943 = vmatpush3.msra.mxu0 %v75_v10  ;;  %v812_v17 = vpop.permute.xlu1 %811 }
  0x81   :  { %696 = vmatpush1.msra.mxu1 %v240_v12  ;;  %944 = vmatprep.subr.mxu0 %v150_v13  ;;  %v799_v19 = vpop.permute.xlu0 %798 }
  0x82   :  { %697 = vmatprep.subr.mxu1 %v979_v56  ;;  %862 = vperm.xlu1 %974, %v859_v14   ;;  %v804_v37 = vsel %vm802_vm1, %v799_v19, %v1786_v9  ;;  %v803_v53 = vsel %vm802_vm1, %v1791_v11, %v799_v19 }
  0x83   :  { %945 = vmatpush3.msra.mxu0 %v70_v15  ;;  %698 = vmatpush1.msra.mxu1 %v235_v16  ;;  %v809_v47 = vmax.f32 %v1112_v35, %v804_v37  ;;  %v808_v59 = vmax.f32 %v1084_v25, %v803_v53  ;;  %v280_v25 = vld [vmem:[%s1987_s0 + $0x7c8] sm:$0xff] }
  0x84   :  { %946 = vmatprep.subr.mxu0 %v145_v18  ;;  %699 = vmatprep.subr.mxu1 %v979_v56  ;;  %v816_v34 = vpop.permute.xlu1 %815 }
  0x85   :  { %947 = vmatpush3.msra.mxu0 %v65_v20  ;;  %700 = vmatpush1.msra.mxu1 %v230_v23  ;;  %v814_v36 = vpop.permute.xlu0 %813  ;;  %v1866_v50 = vmax.f32 %v810_v42, %v816_v34 }
  0x86   :  { %948 = vmatprep.subr.mxu0 %v140_v24  ;;  %701 = vmatprep.subr.mxu1 %v979_v56  ;;  %v819_v44 = vsel %vm817_vm2, %v814_v36, %v816_v34  ;;  %v818_v57 = vsel %vm817_vm2, %v812_v17, %v814_v36 }
  0x87   :  { %949 = vmatpush3.msra.mxu0 %v60_v28  ;;  %702 = vmatpush1.msra.mxu1 %v225_v29  ;;  %v1871_v35 = vmax.f32 %v809_v47, %v819_v44  ;;  %v823_v61 = vmax.f32 %v808_v59, %v818_v57 }
  0x88   :  { %950 = vmatprep.subr.mxu0 %v135_v31  ;;  %703 = vmatprep.subr.mxu1 %v979_v56 }
  0x89   :  { %951 = vmatpush3.msra.mxu0 %v55_v32  ;;  %704 = vmatpush1.msra.mxu1 %v220_v33 }
  0x8a   :  { %952 = vmatprep.subr.mxu0 %v130_v38  ;;  %705 = vmatprep.subr.mxu1 %v979_v56 }
  0x8b   :  { %953 = vmatpush3.msra.mxu0 %v50_v39  ;;  %706 = vmatpush1.msra.mxu1 %v215_v41 }
  0x8c   :  { %954 = vmatprep.subr.mxu0 %v125_v45  ;;  %707 = vmatprep.subr.mxu1 %v979_v56 }
  0x8d   :  { %955 = vmatpush3.msra.mxu0 %v45_v48  ;;  %708 = vmatpush1.msra.mxu1 %v210_v21 }
  0x8e   :  { %956 = vmatprep.subr.mxu0 %v120_v51  ;;  %709 = vmatprep.subr.mxu1 %v979_v56 }
  0x8f   :  { %833 = vrot.lane.b32.xlu0 %v1866_v50, %s980_s16  ;;  %957 = vmatpush3.msra.mxu0 %v40_v52 }
  0x90   :  { %710 = vmatpush1.msra.mxu1 %v205_v54  ;;  %831 = vrot.lane.b32.xlu1 %v1871_v35, %s980_s16 }
  0x91   :  { %958 = vmatprep.subr.mxu0 %v115_v55  ;;  %711 = vmatprep.subr.mxu1 %v979_v56 }
  0x92   :  { %959 = vmatpush3.msra.mxu0 %v35_v58  ;;  %672 = vmatprep.mubr.f32.mxu0 %v1458_v22  ;;  %v275_v22 = vld [vmem:[%s1987_s0 + $0x7a0] sm:$0xff] }
  0x93   :  { %712 = vmatpush1.msra.mxu1 %v200_v60  ;;  %673 = vmatmul.mubr.f32.vlgmr.msra.gmra.mxu0 %v1469_v26  ;;  %v868_v26 = vld [vmem:[%s1991_s5] sm:$0xff] }
  0x94   :  { %713 = vmatprep.subr.mxu1 %v979_v56  ;;  %829 = vrot.lane.b32.xlu0 %v823_v61, %s980_s16 }
  0x95   :  { %714 = vmatpush1.msra.mxu1 %v195_v62  ;;  %846 = vrot.lane.b32.xlu1 %v1871_v35, %s981_s26 }
  0x96   :  { %743 = vmatprep.subr.mxu1 %v979_v56  ;;  %677 = vmatprep.mubr.f32.mxu0 %v1506_v40  ;;  %v282_v40 = vld [vmem:[%s1992_s3 + $0x8] sm:$0xf] }
  0x97   :  { %744 = vmatpush2.msra.mxu1 %v280_v25  ;;  %678 = vmatmul.mubr.f32.gmra.mxu0 %v1517_v43  ;;  %v281_v43 = vld [vmem:[%s1992_s3] sm:$0xff]  ;;  %s982_s3 = smov 43  }
  0x98   :  { %745 = vmatprep.subr.mxu1 %v979_v56  ;;  %844 = vrot.lane.b32.xlu0 %v823_v61, %s981_s26 }
  0x99   :  { %746 = vmatpush2.msra.mxu1 %v275_v22  ;;  %926 = vmatprep.mubr.msk.f32.mxu1 %vm293_vm0, %v1280_v27 }
  0x9a   :  { %871 = vperm.xlu1 %974, %v868_v26   ;;  %748 = vmatmul.mubr.f32.vlgmr.msra.gmra.mxu1 %v1291_v30 }
  0x9b   :  { %927 = vmatprep.mubr.msk.f32.mxu1 %vm293_vm0, %v1529_v46 }
  0x9c   :  { %848 = vrot.lane.b32.xlu0 %v1866_v50, %s981_s26 }
  0x9e   :  { %290 = vperm.xlu1 %974, %v282_v40   ;;  %753 = vmatmul.mubr.f32.gmra.mxu1 %v1541_v49 }
  0xa0   :  { %285 = vperm.xlu0 %975, %v281_v43  }
  0xec   :  { %v443_v5 = vpop.f32.mrf.mxu1 }
  0xee   :  { %v445_v14 = vpop.f32.mrf.mxu1 }
  0xfd   :  { %v863_v27 = vpop.permute.xlu1 %862 }
 0x101   :  { %v834_v56 = vpop.permute.xlu0 %833 }
 0x102   :  { %v832_v30 = vpop.permute.xlu1 %831  ;;  %v843_v6 = vmax.f32 %v1866_v50, %v834_v56 }
 0x103   :  { %v837_v0 = vsel %vm835_vm3, %v832_v30, %v834_v56 }
 0x104   :  { %v842_v7 = vmax.f32 %v1871_v35, %v837_v0 }
 0x106   :  { %v830_v63 = vpop.permute.xlu0 %829 }
 0x107   :  { %v836_v1 = vsel %vm835_vm3, %v830_v63, %v832_v30  ;;  %v847_v3 = vpop.permute.xlu1 %846 }
 0x108   :  { %v841_v8 = vmax.f32 %v823_v61, %v836_v1 }
 0x109   :  { %v366_v2 = vpop.f32.mrf.mxu0 }
 0x10a   :  { %v845_v46 = vpop.permute.xlu0 %844 }
 0x10b   :  { %v851_v4 = vsel %vm850_vm4, %v845_v46, %v847_v3  ;;  %v368_v10 = vpop.f32.mrf.mxu0 }
 0x10c   :  { %v856_v11 = vmax.f32 %v841_v8, %v851_v4 }
 0x10e   :  { %v849_v49 = vpop.permute.xlu0 %848  ;;  %v865_v17 = vmul.f32 %v863_v27, %v856_v11 }
 0x10f   :  { %v852_v9 = vsel %vm850_vm4, %v847_v3, %v849_v49  ;;  %v858_v13 = vmax.f32 %v843_v6, %v849_v49 }
 0x110   :  { %v857_v12 = vmax.f32 %v842_v7, %v852_v9  ;;  %v372_v16 = vpop.f32.mrf.mxu0 }
 0x111   :  { %v867_v18 = vmul.f32 %v863_v27, %v858_v13 }
 0x112   :  { %v866_v15 = vmul.f32 %v863_v27, %v857_v12  ;;  %v374_v29 = vpop.f32.mrf.mxu0 }
 0x113   :  { %v449_v20 = vpop.f32.mrf.mxu1 }
 0x115   :  { %v872_v19 = vpop.permute.xlu1 %871  ;;  %v451_v36 = vpop.f32.mrf.mxu1 }
 0x116   :  { %v874_v23 = vadd.f32 %v872_v19, %v865_v17  ;;  %v875_v24 = vadd.f32 %v872_v19, %v866_v15  ;;  %v876_v28 = vadd.f32 %v872_v19, %v867_v18 }
 0x118   :  { %v878_v31 = vmax.f32 %v875_v24, 0.0  ;;  %v879_v32 = vmax.f32 %v876_v28, 0.0  ;;  %v877_v33 = vmax.f32 %v874_v23, 0.0 }
 0x119   :  { %v1932_v34 = vpop.permute.xlu1 %290 }
 0x11a   :  { %v375_v37 = vadd.f32 %v374_v29, %v1932_v34  ;;  %v373_v38 = vadd.f32 %v372_v16, %v1932_v34  ;;  %902 = vrot.lane.b32.xlu0 %v877_v33, %s982_s3  ;;  %v885_v39 = vrot.slane %v879_v32, 4  ;;  %v884_v41 = vrot.slane %v878_v31, 4 }
 0x11b   :  { %v286_v42 = vpop.permute.xlu0 %285  ;;  %v883_v21 = vrot.slane %v877_v33, 4 }
 0x11c   :  { %v450_v44 = vadd.f32 %v449_v20, %v373_v38  ;;  %v452_v45 = vadd.f32 %v451_v36, %v375_v37  ;;  %890 = vrot.lane.b32.xlu1 %v885_v39, %s983_s2  ;;  %v367_v47 = vadd.f32 %v366_v2, %v286_v42  ;;  %v369_v48 = vadd.f32 %v368_v10, %v286_v42 }
 0x11e   :  { %v763_v50 = vmax.f32 %v450_v44, 0.0  ;;  %v764_v51 = vmax.f32 %v452_v45, 0.0  ;;  %888 = vrot.lane.b32.xlu0 %v884_v41, %s983_s2  ;;  %v444_v35 = vadd.f32 %v443_v5, %v367_v47  ;;  %v446_v52 = vadd.f32 %v445_v14, %v369_v48 }
 0x120   :  { %773 = vst [vmem:[%s1993_s6 + $0x28] sm:$0xf] %v763_v50  ;;  %774 = vst [vmem:[%s1993_s6 + $0x30] sm:$0xf] %v764_v51  ;;  %886 = vrot.lane.b32.xlu1 %v883_v21, %s983_s2  ;;  %v758_v53 = vmax.f32 %v444_v35, 0.0  ;;  %v759_v54 = vmax.f32 %v446_v52, 0.0 }
 0x122   :  { %906 = vrot.lane.b32.xlu0 %v879_v32, %s982_s3  ;;  %768 = vst [vmem:[%s1993_s6] sm:$0xff] %v758_v53  ;;  %769 = vst [vmem:[%s1993_s6 + $0x8] sm:$0xff] %v759_v54 }
 0x124   :  { %904 = vrot.lane.b32.xlu1 %v878_v31, %s982_s3 }
 0x12f   :  { %v520_v55 = vpop.f32.mrf.mxu1 }
 0x130   :  { %v521_v57 = vadd.f32 %v520_v55, %v286_v42  ;;  %v597_v58 = vpop.f32.mrf.mxu0 }
 0x131   :  { %v522_v59 = vpop.f32.mrf.mxu1 }
 0x132   :  { %v523_v60 = vadd.f32 %v522_v59, %v286_v42  ;;  %v598_v61 = vadd.f32 %v597_v58, %v521_v57  ;;  %v599_v62 = vpop.f32.mrf.mxu0 }
 0x134   :  { %v760_v25 = vmax.f32 %v598_v61, 0.0  ;;  %v526_v22 = vpop.f32.mrf.mxu1  ;;  %v600_v26 = vadd.f32 %v599_v62, %v523_v60 }
 0x135   :  { %v527_v40 = vadd.f32 %v526_v22, %v1932_v34 }
 0x136   :  { %770 = vst [vmem:[%s1993_s6 + $0x10] sm:$0xff] %v760_v25  ;;  %v761_v43 = vmax.f32 %v600_v26, 0.0  ;;  %v528_v27 = vpop.f32.mrf.mxu1 }
 0x137   :  { %v529_v56 = vadd.f32 %v528_v27, %v1932_v34  ;;  %v603_v30 = vpop.f32.mrf.mxu0 }
 0x138   :  { %771 = vst [vmem:[%s1993_s6 + $0x18] sm:$0xff] %v761_v43  ;;  %v604_v63 = vadd.f32 %v603_v30, %v527_v40 }
 0x139   :  { %v605_v46 = vpop.f32.mrf.mxu0 }
 0x13a   :  { %v765_v0 = vmax.f32 %v604_v63, 0.0  ;;  %v606_v1 = vadd.f32 %v605_v46, %v529_v56 }
 0x13c   :  { %775 = vst [vmem:[%s1993_s6 + $0x38] sm:$0xf] %v765_v0  ;;  %v766_v2 = vmax.f32 %v606_v1, 0.0 }
 0x13e   :  { %776 = vst [vmem:[%s1993_s6 + $0x40] sm:$0xf] %v766_v2 }
 0x153   :  { %v960_v3 = vpop.f32.mrf.mxu0 }
 0x155   :  { %v961_v4 = vpop.f32.mrf.mxu0 }
 0x156   :  { %v962_v5 = vadd.f32 %v961_v4, %v960_v3 }
 0x157   :  { %v963_v6 = vpop.f32.mrf.mxu0 }
 0x158   :  { %v675_v7 = vadd.f32 %v962_v5, %v286_v42 }
 0x159   :  { %v964_v8 = vpop.f32.mrf.mxu0 }
 0x15a   :  { %v965_v49 = vadd.f32 %v964_v8, %v963_v6  ;;  %v749_v9 = vpop.f32.mrf.mxu1 }
 0x15b   :  { %v750_v10 = vadd.f32 %v749_v9, %v675_v7 }
 0x15c   :  { %v751_v11 = vpop.f32.mrf.mxu1  ;;  %v680_v12 = vadd.f32 %v965_v49, %v1932_v34 }
 0x15d   :  { %v762_v13 = vmax.f32 %v750_v10, 0.0 }
 0x15e   :  { %v754_v14 = vpop.f32.mrf.mxu1 }
 0x15f   :  { %772 = vst [vmem:[%s1993_s6 + $0x20] sm:$0xff] %v762_v13  ;;  %v755_v15 = vadd.f32 %v754_v14, %v680_v12 }
 0x160   :  { %v756_v16 = vpop.f32.mrf.mxu1 }
 0x161   :  { %v767_v17 = vmax.f32 %v755_v15, 0.0 }
 0x163   :  { %777 = vst [vmem:[%s1993_s6 + $0x48] sm:$0xf] %v767_v17 }
 0x18c   :  { %v903_v18 = vpop.permute.xlu0 %902 }
 0x18e   :  { %v891_v19 = vpop.permute.xlu1 %890 }
 0x18f   :  { %901 = vst.msk [vmem:[%s1993_s6 + $0x38] sm:$0xf0] %vm900_vm5, %v891_v19 }
 0x190   :  { %915 = vst.msk [vmem:[%s1993_s6 + $0x38] sm:$0xf0] %vm914_vm6, %v903_v18  ;;  %v889_v20 = vpop.permute.xlu0 %888 }
 0x191   :  { %v894_v23 = vsel %vm892_vm7, %v889_v20, %v891_v19 }
 0x192   :  { %899 = vst [vmem:[%s1993_s6 + $0x30] sm:$0xf0] %v894_v23  ;;  %v887_v24 = vpop.permute.xlu1 %886 }
 0x193   :  { %v893_v28 = vsel %vm892_vm7, %v887_v24, %v889_v20 }
 0x194   :  { %898 = vst [vmem:[%s1993_s6 + $0x28] sm:$0xf0] %v893_v28  ;;  %v907_v29 = vpop.permute.xlu0 %906 }
 0x196   :  { %v905_v31 = vpop.permute.xlu1 %904 }
 0x197   :  { %v909_v32 = vsel %vm908_vm8, %v903_v18, %v905_v31  ;;  %v910_v33 = vsel %vm908_vm8, %v905_v31, %v907_v29 }
 0x198   :  { %916 = vst [vmem:[%s1993_s6 + $0x40] sm:$0xf0] %v909_v32  ;;  %917 = vst [vmem:[%s1993_s6 + $0x48] sm:$0xf0] %v910_v33 }

</bundles_post_ra>
